<compile_context>
chip_gen: v6e
topology: v6e:2x2x1
jax: 0.10.0
libtpu: 0.0.40
codegen_flags: <defaults>
</compile_context>

<pallas_src>
import jax
import jax.numpy as jnp
import numpy as np
from jax import lax
from jax.experimental import pallas as pl
from jax.experimental.pallas import tpu as pltpu

EPS = 1e-5


def _make_kernel(inv_p: float, matmul_dtype):
    """Build the fused kernel for one Cout tile.

    inv_p = 1 / true_P (compile-time constant).  Padded rows of x are zero, so
    they contribute nothing to the single-pass sums; dividing by the true row
    count keeps the batch statistics exact.
    """

    def kernel(x_ref, w_ref, g1_ref, gb2_ref, o_ref):
        # x_ref  : (P_pad, Cin)  f32   zero-padded activations (channels-last)
        # w_ref  : (Ct,   Cin)   f32   1x1 conv weight tile (torch OI layout)
        # g1_ref : (1,    Cin)   f32   BN1 gamma
        # gb2_ref: (2,    Ct)    f32   row 0 = BN2 gamma, row 1 = BN2 beta
        # o_ref  : (P_pad, Ct)   f32
        x = x_ref[...]

        # ---- BN1 folded into the conv weight (only var1 is needed) ----
        m1 = jnp.sum(x, axis=0, keepdims=True) * inv_p          # E[x]
        q1 = jnp.sum(x * x, axis=0, keepdims=True) * inv_p      # E[x^2]
        var1 = q1 - m1 * m1
        s1 = g1_ref[...] * lax.rsqrt(var1 + EPS)                # (1, Cin)
        w_scaled = w_ref[...] * s1                              # (Ct, Cin)

        # ---- 1x1 conv == channel-mixing matmul (rhs contracted on its last
        #      dim, i.e. x @ W'^T, no explicit weight transpose) ----
        z = lax.dot_general(
            x.astype(matmul_dtype), w_scaled.astype(matmul_dtype),
            dimension_numbers=(((1,), (1,)), ((), ())),
            preferred_element_type=jnp.float32)                 # (P_pad, Ct)

        # ---- BN2 (batch stats over the true P rows), single pass.  Padded
        #      z rows are exactly zero (zero x rows, no bias), so the sums
        #      are unaffected. ----
        m2 = jnp.sum(z, axis=0, keepdims=True) * inv_p
        q2 = jnp.sum(z * z, axis=0, keepdims=True) * inv_p
        inv_std2 = lax.rsqrt(q2 - m2 * m2 + EPS)
        scale2 = gb2_ref[0:1, :] * inv_std2                     # (1, Ct)
        shift2 = gb2_ref[1:2, :] - m2 * scale2                  # (1, Ct)
        # single fused multiply-add -> one store of the output tile
        o_ref[...] = z * scale2 + shift2

    return kernel


def bn_conv_bn_channels_last(x_pc, w_oi, gamma1, gamma2, beta2, *,
                             cout_tile=128, matmul_dtype=jnp.float32):
    """Core fused op on channels-last data.

    x_pc : (P, Cin) flattened activations (P = N*H*W, channels last)
    w_oi : (Cout, Cin) 1x1 conv weight (torch layout, spatial dims squeezed)
    """
    p, cin = x_pc.shape
    cout = w_oi.shape[0]
    assert w_oi.shape[1] == cin
    if cout % cout_tile != 0:
        cout_tile = cout
    n_ct = cout // cout_tile

    # Sublane-align P with zero padding (stats stay exact: divide by true P).
    p_pad = ((p + 7) // 8) * 8
    if p_pad != p:
        x_pc = jnp.pad(x_pc, ((0, p_pad - p), (0, 0)))

    # Guard the whole-P-resident design (see NOTE at top of file).
    resident_bytes = 4 * 2 * (p_pad * cin + cout_tile * cin + p_pad * cout_tile)
    assert resident_bytes < 16 * 1024 * 1024, (
        "activation too large for the single-P-block kernel; tile P")

    g1 = gamma1.reshape(1, cin)
    gb2 = jnp.stack([gamma2.reshape(cout), beta2.reshape(cout)], axis=0)  # (2, Cout)

    kernel = _make_kernel(1.0 / float(p), matmul_dtype)

    out = pl.pallas_call(
        kernel,
        out_shape=jax.ShapeDtypeStruct((p_pad, cout), jnp.float32),
        grid=(n_ct,),
        in_specs=[
            pl.BlockSpec((p_pad, cin), lambda j: (0, 0)),       # x (fetched once)
            pl.BlockSpec((cout_tile, cin), lambda j: (j, 0)),   # W tile
            pl.BlockSpec((1, cin), lambda j: (0, 0)),           # BN1 gamma
            pl.BlockSpec((2, cout_tile), lambda j: (0, j)),     # BN2 gamma/beta
        ],
        out_specs=pl.BlockSpec((p_pad, cout_tile), lambda j: (0, j)),
        compiler_params=pltpu.CompilerParams(
            dimension_semantics=("parallel",)),  # Cout tiles are independent
    )(x_pc, w_oi, g1, gb2)

    return out[:p]


def fused_bn_conv_bn(x_nchw, conv_w, gamma1, beta1, gamma2, beta2, **kw):
    """Module-parity entry point (NCHW in / NCHW out).

    beta1 is accepted for interface parity but provably does not affect the
    forward output (BN2 removes any per-output-channel constant), so it is
    not passed to the kernel.  Callers already holding channels-last data
    should use `bn_conv_bn_channels_last` directly and skip the relayouts.
    """
    del beta1
    n, cin, h, w = x_nchw.shape
    cout = conv_w.shape[0]
    p = n * h * w

    x_pc = jnp.transpose(x_nchw, (0, 2, 3, 1)).reshape(p, cin)   # NCHW -> [P, C]
    w_oi = conv_w.reshape(cout, cin)

    out_pc = bn_conv_bn_channels_last(x_pc, w_oi, gamma1, gamma2, beta2, **kw)
    return jnp.transpose(out_pc.reshape(n, h, w, cout), (0, 3, 1, 2))


def _reference(x_nchw, conv_w, g1, b1, g2, b2):
    """Plain-JAX reference (full BN1 incl. mean/beta, conv, full BN2)."""
    def bn(x, g, b):
        mean = jnp.mean(x, axis=(0, 2, 3), keepdims=True)
        var = jnp.mean((x - mean) ** 2, axis=(0, 2, 3), keepdims=True)
        return (x - mean) * lax.rsqrt(var + EPS) * g.reshape(1, -1, 1, 1) \
               + b.reshape(1, -1, 1, 1)

    y = bn(x_nchw, g1, b1)
    z = lax.conv_general_dilated(
        y, conv_w, window_strides=(1, 1), padding="VALID",
        dimension_numbers=("NCHW", "OIHW", "NCHW"))
    return bn(z, g2, b2)


if __name__ == "__main__":
    key = jax.random.PRNGKey(0)
    k_x, k_w, k_g1, k_b1, k_g2, k_b2 = jax.random.split(key, 6)

    N, CIN, H, W = 1, 64, 14, 14
    COUT = 384

    x = jax.random.normal(k_x, (N, CIN, H, W), dtype=jnp.float32)
    conv_w = jax.random.normal(k_w, (COUT, CIN, 1, 1), dtype=jnp.float32) * 0.1
    gamma1 = 1.0 + 0.1 * jax.random.normal(k_g1, (CIN,), dtype=jnp.float32)
    beta1 = 0.1 * jax.random.normal(k_b1, (CIN,), dtype=jnp.float32)
    gamma2 = 1.0 + 0.1 * jax.random.normal(k_g2, (COUT,), dtype=jnp.float32)
    beta2 = 0.1 * jax.random.normal(k_b2, (COUT,), dtype=jnp.float32)

    out = jax.block_until_ready(
        fused_bn_conv_bn(x, conv_w, gamma1, beta1, gamma2, beta2))
    ref = jax.block_until_ready(
        _reference(x, conv_w, gamma1, beta1, gamma2, beta2))

    assert out.shape == (N, COUT, H, W)
    np.testing.assert_allclose(np.asarray(out), np.asarray(ref),
                               rtol=1e-3, atol=1e-3)
    print("KERNEL_OK")
</pallas_src>

<mosaic_0001>
module attributes {stable_mosaic.version = 11 : i64} {
  func.func @kernel(%arg0: i32, %arg1: memref<200x64xf32, #tpu.memory_space<vmem>>, %arg2: memref<128x64xf32, #tpu.memory_space<vmem>>, %arg3: memref<1x64xf32, #tpu.memory_space<vmem>>, %arg4: memref<2x128xf32, #tpu.memory_space<vmem>>, %arg5: memref<200x128xf32, #tpu.memory_space<vmem>>) attributes {dimension_semantics = [#tpu.dimension_semantics<parallel>], iteration_bounds = array<i64: 3>, scalar_prefetch = 0 : i64, scratch_operands = 0 : i64, tpu.core_type = #tpu.core_type<tc>, window_params = [{pipeline_mode = #tpu.pipeline_mode<synchronous>, transform_indices = @transform_0, window_bounds = array<i64: 200, 64>}, {transform_indices = @transform_1, window_bounds = array<i64: 128, 64>}, {pipeline_mode = #tpu.pipeline_mode<synchronous>, transform_indices = @transform_2, window_bounds = array<i64: 1, 64>}, {transform_indices = @transform_3, window_bounds = array<i64: 2, 128>}, {transform_indices = @transform_4, window_bounds = array<i64: 200, 128>}]} {
    %c0 = arith.constant 0 : index
    %c0_0 = arith.constant 0 : index
    %0 = vector.load %arg1[%c0, %c0_0] : memref<200x64xf32, #tpu.memory_space<vmem>>, vector<200x64xf32>
    %cst = arith.constant dense<0.000000e+00> : vector<64xf32>
    %1 = vector.multi_reduction <add>, %0, %cst [0] : vector<200x64xf32> to vector<64xf32>
    %2 = vector.shape_cast %1 : vector<64xf32> to vector<1x64xf32>
    %cst_1 = arith.constant 0.00510204071 : f32
    %3 = vector.broadcast %cst_1 : f32 to vector<1x64xf32>
    %4 = arith.mulf %2, %3 : vector<1x64xf32>
    %5 = arith.mulf %0, %0 : vector<200x64xf32>
    %cst_2 = arith.constant dense<0.000000e+00> : vector<64xf32>
    %6 = vector.multi_reduction <add>, %5, %cst_2 [0] : vector<200x64xf32> to vector<64xf32>
    %7 = vector.shape_cast %6 : vector<64xf32> to vector<1x64xf32>
    %cst_3 = arith.constant 0.00510204071 : f32
    %8 = vector.broadcast %cst_3 : f32 to vector<1x64xf32>
    %9 = arith.mulf %7, %8 : vector<1x64xf32>
    %10 = arith.mulf %4, %4 : vector<1x64xf32>
    %11 = arith.subf %9, %10 : vector<1x64xf32>
    %c0_4 = arith.constant 0 : index
    %c0_5 = arith.constant 0 : index
    %12 = vector.load %arg3[%c0_4, %c0_5] : memref<1x64xf32, #tpu.memory_space<vmem>>, vector<1x64xf32>
    %cst_6 = arith.constant 9.99999974E-6 : f32
    %13 = vector.broadcast %cst_6 : f32 to vector<1x64xf32>
    %14 = arith.addf %11, %13 : vector<1x64xf32>
    %15 = math.rsqrt %14 : vector<1x64xf32>
    %16 = arith.mulf %12, %15 : vector<1x64xf32>
    %c0_7 = arith.constant 0 : index
    %c0_8 = arith.constant 0 : index
    %17 = vector.load %arg2[%c0_7, %c0_8] : memref<128x64xf32, #tpu.memory_space<vmem>>, vector<128x64xf32>
    %18 = vector.broadcast %16 : vector<1x64xf32> to vector<128x64xf32>
    %19 = arith.mulf %17, %18 : vector<128x64xf32>
    %cst_9 = arith.constant dense<0.000000e+00> : vector<200x128xf32>
    %20 = tpu.matmul %0, %19, %cst_9 {dimension_numbers = #tpu.dot_dimension_numbers<[1], [1], [0], [0], [0, 0, 1, 0], [], []>} : vector<200x64xf32>, vector<128x64xf32>, vector<200x128xf32> -> vector<200x128xf32>
    %cst_10 = arith.constant dense<0.000000e+00> : vector<128xf32>
    %21 = vector.multi_reduction <add>, %20, %cst_10 [0] : vector<200x128xf32> to vector<128xf32>
    %22 = vector.shape_cast %21 : vector<128xf32> to vector<1x128xf32>
    %cst_11 = arith.constant 0.00510204071 : f32
    %23 = vector.broadcast %cst_11 : f32 to vector<1x128xf32>
    %24 = arith.mulf %22, %23 : vector<1x128xf32>
    %25 = arith.mulf %20, %20 : vector<200x128xf32>
    %cst_12 = arith.constant dense<0.000000e+00> : vector<128xf32>
    %26 = vector.multi_reduction <add>, %25, %cst_12 [0] : vector<200x128xf32> to vector<128xf32>
    %27 = vector.shape_cast %26 : vector<128xf32> to vector<1x128xf32>
    %cst_13 = arith.constant 0.00510204071 : f32
    %28 = vector.broadcast %cst_13 : f32 to vector<1x128xf32>
    %29 = arith.mulf %27, %28 : vector<1x128xf32>
    %30 = arith.mulf %24, %24 : vector<1x128xf32>
    %31 = arith.subf %29, %30 : vector<1x128xf32>
    %cst_14 = arith.constant 9.99999974E-6 : f32
    %32 = vector.broadcast %cst_14 : f32 to vector<1x128xf32>
    %33 = arith.addf %31, %32 : vector<1x128xf32>
    %34 = math.rsqrt %33 : vector<1x128xf32>
    %c0_15 = arith.constant 0 : index
    %c0_16 = arith.constant 0 : index
    %35 = vector.load %arg4[%c0_15, %c0_16] : memref<2x128xf32, #tpu.memory_space<vmem>>, vector<1x128xf32>
    %36 = arith.mulf %35, %34 : vector<1x128xf32>
    %c1 = arith.constant 1 : index
    %c0_17 = arith.constant 0 : index
    %37 = vector.load %arg4[%c1, %c0_17] : memref<2x128xf32, #tpu.memory_space<vmem>>, vector<1x128xf32>
    %38 = arith.mulf %24, %36 : vector<1x128xf32>
    %39 = arith.subf %37, %38 : vector<1x128xf32>
    %40 = vector.broadcast %36 : vector<1x128xf32> to vector<200x128xf32>
    %41 = arith.mulf %20, %40 : vector<200x128xf32>
    %42 = vector.broadcast %39 : vector<1x128xf32> to vector<200x128xf32>
    %43 = arith.addf %41, %42 : vector<200x128xf32>
    %c0_18 = arith.constant 0 : index
    %c0_19 = arith.constant 0 : index
    %44 = vector.load %arg5[%c0_18, %c0_19] : memref<200x128xf32, #tpu.memory_space<vmem>>, vector<200x128xf32>
    tpu.vector_store %arg5[%c0_18, %c0_19], %43 {strides = array<i32>} : memref<200x128xf32, #tpu.memory_space<vmem>>, vector<200x128xf32>,
    return
  }
  func.func @transform_0(%arg0: i32) -> (i32, i32) {
    %c0_i32 = arith.constant 0 : i32
    %c0_i32_0 = arith.constant 0 : i32
    %c0_i32_1 = arith.constant 0 : i32
    return %c0_i32, %c0_i32_0 : i32, i32
  }
  func.func @transform_1(%arg0: i32) -> (i32, i32) {
    %c0_i32 = arith.constant 0 : i32
    %c0_i32_0 = arith.constant 0 : i32
    return %arg0, %c0_i32 : i32, i32
  }
  func.func @transform_2(%arg0: i32) -> (i32, i32) {
    %c0_i32 = arith.constant 0 : i32
    %c0_i32_0 = arith.constant 0 : i32
    %c0_i32_1 = arith.constant 0 : i32
    return %c0_i32, %c0_i32_0 : i32, i32
  }
  func.func @transform_3(%arg0: i32) -> (i32, i32) {
    %c0_i32 = arith.constant 0 : i32
    %c0_i32_0 = arith.constant 0 : i32
    return %c0_i32, %arg0 : i32, i32
  }
  func.func @transform_4(%arg0: i32) -> (i32, i32) {
    %c0_i32 = arith.constant 0 : i32
    %c0_i32_0 = arith.constant 0 : i32
    return %c0_i32, %arg0 : i32, i32
  }
}

</mosaic_0001>

<bundles_post_ra>
// kernel: tpu_custom_call.1
= control target key start
LH: loop header
LB: loop body
LE: loop exit
PB: predicated region body
PF: predicated region fallthrough
CT: control target
= control target key end

     0   :  { %9 = vsyncpa [#allocation3], 0  ;;  %s2120_s0 = inlined_call_operand.vmem [shape: f32[200,64], index: 0, kind: input, shape index: {}]   ;;  %s2121_s1 = inlined_call_operand.vmem [shape: f32[384,64], index: 1, kind: input, shape index: {}]   ;;  %s2122_s2 = inlined_call_operand.vmem [shape: f32[1,64], index: 2, kind: input, shape index: {}]   ;;  %s2123_s3 = inlined_call_operand.vmem [shape: f32[2,384], index: 3, kind: input, shape index: {}]   ;;  %s2124_s4 = inlined_call_operand.hbm [shape: f32[200,384], index: 4, kind: output, shape index: {}]  }
   0x1   :  { %11 = vsyncpa [#allocation3 + $0x1], 0  ;;  %s1374_s15 = smov 0   ;;  %s1376_s16 = smov 0  }
   0x2   :  { %s1378_s17 = smov 0   ;;  %s1380_s18 = smov 0  }
   0x3 LB: > { %s1395_s19 = sadd.s32 4294967295, %s1341_s18   ;;  %s1001_s20 = sadd.s32 4294967294, %s1341_s18   ;;  %s1341_s18 = sphi %s1380_s18, %s2130_s18   ;;  %s1337_s17 = sphi %s1378_s17, %s2129_s17   ;;  %s1333_s16 = sphi %s1376_s16, %s2128_s16   ;;  %s1329_s15 = sphi %s1374_s15, %s2127_s15  }
   0x4   : > { %s1399_s21 = sadd.s32 1, %s1341_s18   ;;  %s118_s22 = sadd.s32 1, %s1337_s17 }
   0x5   : > { %s115_s23 = ssub.s32 %s1341_s18, %s1399_s21  ;;  %p128_p0 = scmp.ne.s32.totalorder %s1337_s17, %s1333_s16 }
   0x6   : > { %p116_p1 = scmp.eq.s32.totalorder %s115_s23, 0  ;;  %p129_p2 = scmp.eq.s32.totalorder %s1395_s19, 2 }
   0x7   : > { %p134_p3 = scmp.ne.s32.totalorder %s1333_s16, %s1329_s15  ;;  %p135_p4 = scmp.eq.s32.totalorder %s1001_s20, 2 }
   0x8   : > { %s1410_s24 = scalar_select %p116_p1, %s1337_s17, %s118_s22  }
   0x9   : > { %p1412_p5 = por %p129_p2, %p128_p0  ;;  %p1416_p6 = por %p135_p4, %p134_p3 }
   0xa   : > { %p1004_p7 = scmp.ge.s32.totalorder %s1341_s18, 1  ;;  %p175_p8 = scmp.lt.s32.totalorder %s1341_s18, 4 }
   0xc   : > { %p176_p9 = pnand %p1004_p7, %p175_p8 }
   0xd   : > { %s1005_s23 = sshll.u32 (!%p176_p9), %s1395_s19, 4  ;;  %p211_p11 = scmp.lt.s32.totalorder (!%p176_p9), %s1395_s19, 2 }
   0xe   : > { %179 = sbr.rel (%p176_p9) target bundleno = 515 (0x203), region = 36  ;;  %p206_p10 = scmp.lt.s32.totalorder (!%p176_p9), %s1005_s23, 47 }
   0xf   : > { %s202_s12 = sand.u32 (!%p176_p9), 1, %s1333_s16   ;;  %s1049_s20 = sshll.u32 (!%p176_p9), %s1395_s19, 7 }
  0x10   : > { %s1232_s13 = smul.u32 (!%p176_p9), 200, %s202_s12  ;;  %s2080_s28 = scalar_lea.sflag (!%p176_p9), [#allocation3], %s202_s12 }
  0x11   : > { %s1345_s30 = smov (!%p176_p9), [#allocation2]  }
  0x12   : > { %s2038_s14 = scalar_lea.vmem (!%p176_p9), [#allocation2], %s1232_s13  ;;  %s1285_s5 = sshll.u32 (!%p176_p9), %s1345_s30, 4  ;;  %s1286_s5 = int_to_ptr.vmem [resolvable:$false] %s1285_s5 }
  0x13   : > { %v1425_v0 = vld [vmem:[%s2120_s0] sm:$0xff]  ;;  %v1430_v1 = vld [vmem:[%s2120_s0 + $0x8] sm:$0xff]  ;;  %v1435_v2 = vld [vmem:[%s2120_s0 + $0x10] sm:$0xff]  ;;  %vm240_vm0 = vcmask 523264   ;;  %v1343_v3 = vmov 0.0   ;;  %vm1344_vm1 = vmmov 0  }
  0x14   : > { %1093 = vmatprep.subr.mxu0 %v1343_v3  ;;  %v1441_v4 = vld [vmem:[%s2120_s0 + $0x18] sm:$0xff]  ;;  %v241_v5 = vsel %vm240_vm0, %v1425_v0, 0.0  ;;  %v242_v6 = vsel %vm240_vm0, %v1430_v1, 0.0  ;;  %1200 = vmatprep.subr.mxu1 %v1343_v3  ;;  %v1451_v7 = vld [vmem:[%s2120_s0 + $0x20] sm:$0xff]  ;;  %v244_v9 = vsel %vm240_vm0, %v1435_v2, 0.0  ;;  %v1460_v11 = vld [vmem:[%s2120_s0 + $0x28] sm:$0xff]  ;;  %v297_v24 = vmul.f32 %v1425_v0, %v1425_v0 }
  0x15   : > { %v243_v8 = vadd.f32 %v242_v6, %v241_v5  ;;  %v246_v10 = vsel %vm240_vm0, %v1441_v4, 0.0  ;;  %v248_v13 = vsel %vm240_vm0, %v1451_v7, 0.0  ;;  %v1467_v14 = vld [vmem:[%s2120_s0 + $0x30] sm:$0xff]  ;;  %v250_v16 = vsel %vm240_vm0, %v1460_v11, 0.0  ;;  %v1474_v17 = vld [vmem:[%s2120_s0 + $0x38] sm:$0xff]  ;;  %v1481_v20 = vld [vmem:[%s2120_s0 + $0x40] sm:$0xff]  ;;  %1125 = vmatprep.mubr.msk.f32.mxu0 %vm1344_vm1, %v1343_v3  ;;  %1164 = vmatprep.mubr.msk.f32.mxu1 %vm1344_vm1, %v1343_v3 }
  0x16   : > { %v252_v19 = vsel %vm240_vm0, %v1467_v14, 0.0  ;;  %v1486_v22 = vld [vmem:[%s2120_s0 + $0x48] sm:$0xff]  ;;  %v254_v23 = vsel %vm240_vm0, %v1474_v17, 0.0  ;;  %v298_v25 = vmul.f32 %v1430_v1, %v1430_v1  ;;  %v299_v26 = vmul.f32 %v1435_v2, %v1435_v2  ;;  %v1503_v30 = vld [vmem:[%s2120_s0 + $0x50] sm:$0xff]  ;;  %v1515_v37 = vld [vmem:[%s2120_s0 + $0x58] sm:$0xff]  ;;  %s2132_s23 = smov (!%p206_p10, %s1005_s23), 47 }
  0x17   : > { %v245_v12 = vadd.f32 %v244_v9, %v243_v8  ;;  %v256_v28 = vsel %vm240_vm0, %v1481_v20, 0.0  ;;  %v300_v29 = vmul.f32 %v1441_v4, %v1441_v4  ;;  %v258_v32 = vsel %vm240_vm0, %v1486_v22, 0.0  ;;  %v1525_v43 = vld [vmem:[%s2120_s0 + $0x60] sm:$0xff]  ;;  %v1535_v49 = vld [vmem:[%s2120_s0 + $0x68] sm:$0xff]  ;;  %v1545_v55 = vld [vmem:[%s2120_s0 + $0x70] sm:$0xff]  ;;  %s1006_s27 = sshll.u32 %s2132_s23, 3 }
  0x18   : > { %v301_v33 = vmul.f32 %v1451_v7, %v1451_v7  ;;  %v322_v34 = vsel %vm240_vm0, %v297_v24, 0.0  ;;  %v323_v35 = vsel %vm240_vm0, %v298_v25, 0.0  ;;  %v325_v36 = vsel %vm240_vm0, %v299_v26, 0.0  ;;  %v1555_v61 = vld [vmem:[%s2120_s0 + $0x78] sm:$0xff]  ;;  %v1565_v9 = vld [vmem:[%s2120_s0 + $0x80] sm:$0xff]  ;;  %v1585_v26 = vld [vmem:[%s2120_s0 + $0x90] sm:$0xff]  ;;  %s1685_s6 = scalar_lea.vmem %s2121_s1, %s1006_s27  ;;  %s2058_s27 = scalar_lea.hbm %s2124_s4, %s1049_s20 }
  0x19   : > { %v247_v15 = vadd.f32 %v246_v10, %v245_v12  ;;  %v324_v39 = vadd.f32 %v323_v35, %v322_v34  ;;  %v260_v40 = vsel %vm240_vm0, %v1503_v30, 0.0  ;;  %v302_v41 = vmul.f32 %v1460_v11, %v1460_v11  ;;  %s212_s7 = scalar_select %p211_p11, %s1395_s19, 2 }
  0x1a   : > { %v327_v42 = vsel %vm240_vm0, %v300_v29, 0.0  ;;  %v262_v46 = vsel %vm240_vm0, %v1515_v37, 0.0  ;;  %v303_v47 = vmul.f32 %v1467_v14, %v1467_v14  ;;  %v329_v48 = vsel %vm240_vm0, %v301_v33, 0.0  ;;  %v1595_v33 = vld [vmem:[%s2120_s0 + $0x98] sm:$0xff]  ;;  %s927_s22 = sshll.u32 %s2038_s14, 4  ;;  %s2064_s22 = int_to_ptr.vmem [resolvable:$true] %s927_s22 }
  0x1b   : > { %v249_v18 = vadd.f32 %v248_v13, %v247_v15  ;;  %v326_v45 = vadd.f32 %v325_v36, %v324_v39  ;;  %v264_v52 = vsel %vm240_vm0, %v1525_v43, 0.0  ;;  %v304_v53 = vmul.f32 %v1474_v17, %v1474_v17  ;;  %s1007_s8 = sshll.u32 %s212_s7, 1  ;;  %s1281_s29 = scalar_lea.vmem %s2064_s22, 3200 }
  0x1c   : > { %v331_v54 = vsel %vm240_vm0, %v302_v41, 0.0  ;;  %v266_v58 = vsel %vm240_vm0, %v1535_v49, 0.0  ;;  %v305_v59 = vmul.f32 %v1481_v20, %v1481_v20  ;;  %v333_v60 = vsel %vm240_vm0, %v303_v47, 0.0  ;;  %v1619_v47 = vld [vmem:[%s2120_s0 + $0xa8] sm:$0xff]  ;;  %s214_s11 = scalar_lea.vmem %s2123_s3, %s1007_s8  ;;  %p1282_p12 = scmp.ne.s32.totalorder %s2064_s22, %s1281_s29 }
  0x1d   : > { %v251_v21 = vadd.f32 %v250_v16, %v249_v18  ;;  %v328_v51 = vadd.f32 %v327_v42, %v326_v45  ;;  %v268_v5 = vsel %vm240_vm0, %v1545_v55, 0.0  ;;  %v306_v6 = vmul.f32 %v1486_v22, %v1486_v22  ;;  %v1575_v18 = vld [vmem:[%s2120_s0 + $0x88] sm:$0xff]  ;;  %p1288_p1 = scmp.lt.s32.totalorder %s2064_s22, %s1286_s5 }
  0x1e   : > { %v335_v8 = vsel %vm240_vm0, %v304_v53, 0.0  ;;  %v270_v13 = vsel %vm240_vm0, %v1555_v61, 0.0  ;;  %v307_v15 = vmul.f32 %v1503_v30, %v1503_v30  ;;  %v337_v16 = vsel %vm240_vm0, %v305_v59, 0.0  ;;  %p1283_p13 = pnand %p1282_p12, %p1412_p5 }
  0x1f   : > { %v253_v27 = vadd.f32 %v252_v19, %v251_v21  ;;  %v330_v57 = vadd.f32 %v329_v48, %v328_v51  ;;  %v308_v24 = vmul.f32 %v1515_v37, %v1515_v37  ;;  %v339_v25 = vsel %vm240_vm0, %v306_v6, 0.0 }
  0x20   : > { %v274_v29 = vsel %vm240_vm0, %v1575_v18, 0.0  ;;  %v276_v36 = vsel %vm240_vm0, %v1585_v26, 0.0  ;;  %v311_v45 = vmul.f32 %v1545_v55, %v1545_v55  ;;  %v313_v59 = vmul.f32 %v1565_v9, %v1565_v9  ;;  %p1284_p0 = pneg %p1283_p13 }
  0x21   : > { %v255_v31 = vadd.f32 %v254_v23, %v253_v27  ;;  %v332_v63 = vadd.f32 %v331_v54, %v330_v57  ;;  %v272_v23 = vsel %vm240_vm0, %v1565_v9, 0.0  ;;  %v343_v39 = vsel %vm240_vm0, %v308_v24, 0.0  ;;  %v1629_v54 = vld [vmem:[%s2120_s0 + $0xb0] sm:$0xff] }
  0x22   : > { %v284_v6 = vsel %vm240_vm0, %v1629_v54, 0.0 }
  0x23   : > { %v257_v38 = vadd.f32 %v256_v28, %v255_v31  ;;  %v334_v12 = vadd.f32 %v333_v60, %v332_v63  ;;  %v309_v31 = vmul.f32 %v1525_v43, %v1525_v43  ;;  %v349_v60 = vsel %vm240_vm0, %v311_v45, 0.0 }
  0x25   : > { %v259_v44 = vadd.f32 %v258_v32, %v257_v38  ;;  %v336_v21 = vadd.f32 %v335_v8, %v334_v12  ;;  %v341_v32 = vsel %vm240_vm0, %v307_v15, 0.0  ;;  %v310_v38 = vmul.f32 %v1535_v49, %v1535_v49  ;;  %v1649_v12 = vld [vmem:[%s2120_s0 + $0xc0] sm:$0xff] }
  0x26   : > { %v314_v8 = vmul.f32 %v1575_v18, %v1575_v18 }
  0x27   : > { %v261_v50 = vadd.f32 %v260_v40, %v259_v44  ;;  %v338_v28 = vadd.f32 %v337_v16, %v336_v21  ;;  %v1605_v40 = vld [vmem:[%s2120_s0 + $0xa0] sm:$0xff]  ;;  %v278_v44 = vsel %vm240_vm0, %v1595_v33, 0.0  ;;  %v347_v53 = vsel %vm240_vm0, %v310_v38, 0.0 }
  0x28   : > { %v280_v51 = vsel %vm240_vm0, %v1605_v40, 0.0  ;;  %v353_v21 = vsel %vm240_vm0, %v313_v59, 0.0  ;;  %v318_v38 = vmul.f32 %v1619_v47, %v1619_v47 }
  0x29   : > { %v263_v56 = vadd.f32 %v262_v46, %v261_v50  ;;  %v340_v35 = vadd.f32 %v339_v25, %v338_v28  ;;  %v345_v46 = vsel %vm240_vm0, %v309_v31, 0.0  ;;  %v288_v25 = vsel %vm240_vm0, %v1649_v12, 0.0 }
  0x2a   : > { %v355_v28 = vsel %vm240_vm0, %v314_v8, 0.0 }
  0x2b   : > { %v265_v62 = vadd.f32 %v264_v52, %v263_v56  ;;  %v342_v42 = vadd.f32 %v341_v32, %v340_v35  ;;  %v312_v52 = vmul.f32 %v1555_v61, %v1555_v61  ;;  %v317_v32 = vmul.f32 %v1605_v40, %v1605_v40 }
  0x2d   : > { %v267_v10 = vadd.f32 %v266_v58, %v265_v62  ;;  %v344_v50 = vadd.f32 %v343_v39, %v342_v42  ;;  %v282_v58 = vsel %vm240_vm0, %v1619_v47, 0.0  ;;  %v1639_v62 = vld [vmem:[%s2120_s0 + $0xb8] sm:$0xff]  ;;  %v361_v45 = vsel %vm240_vm0, %v317_v32, 0.0 }
  0x2e   : > { %v286_v16 = vsel %vm240_vm0, %v1639_v62, 0.0  ;;  %v401_v32 = vlaneseq }
  0x2f   : > { %v269_v19 = vadd.f32 %v268_v5, %v267_v10  ;;  %v346_v57 = vadd.f32 %v345_v46, %v344_v50  ;;  %v351_v10 = vsel %vm240_vm0, %v312_v52, 0.0  ;;  %v320_v50 = vmul.f32 %v1639_v62, %v1639_v62 }
  0x31   : > { %v271_v27 = vadd.f32 %v270_v13, %v269_v19  ;;  %v348_v5 = vadd.f32 %v347_v53, %v346_v57  ;;  %v315_v19 = vmul.f32 %v1585_v26, %v1585_v26  ;;  %v367_v59 = vsel %vm240_vm0, %v320_v50, 0.0 }
  0x33   : > { %v273_v34 = vadd.f32 %v272_v23, %v271_v27  ;;  %v350_v15 = vadd.f32 %v349_v60, %v348_v5  ;;  %v316_v27 = vmul.f32 %v1595_v33, %v1595_v33 }
  0x35   : > { %v275_v41 = vadd.f32 %v274_v29, %v273_v34  ;;  %v352_v24 = vadd.f32 %v351_v10, %v350_v15  ;;  %v357_v34 = vsel %vm240_vm0, %v315_v19, 0.0  ;;  %v359_v39 = vsel %vm240_vm0, %v316_v27, 0.0 }
  0x37   : > { %v277_v48 = vadd.f32 %v276_v36, %v275_v41  ;;  %v354_v31 = vadd.f32 %v353_v21, %v352_v24 }
  0x39   : > { %v279_v56 = vadd.f32 %v278_v44, %v277_v48  ;;  %v356_v36 = vadd.f32 %v355_v28, %v354_v31  ;;  %v319_v44 = vmul.f32 %v1629_v54, %v1629_v54 }
  0x3b   : > { %v281_v63 = vadd.f32 %v280_v51, %v279_v56  ;;  %v358_v42 = vadd.f32 %v357_v34, %v356_v36  ;;  %v363_v51 = vsel %vm240_vm0, %v318_v38, 0.0  ;;  %v321_v56 = vmul.f32 %v1649_v12, %v1649_v12 }
  0x3c   : > { %v365_v57 = vsel %vm240_vm0, %v319_v44, 0.0  ;;  %v402_v34 = vshrl.u32 %v401_v32, 7  ;;  %v398_v44 = vld [vmem:[%s1685_s6 + $0x70] sm:$0xff] }
  0x3d   : > { %v283_v13 = vadd.f32 %v282_v58, %v281_v63  ;;  %v360_v48 = vadd.f32 %v359_v39, %v358_v42  ;;  %v369_v5 = vsel %vm240_vm0, %v321_v56, 0.0 }
  0x3e   : > { %v1687_v36 = vsub.s32 0, %v402_v34 }
  0x3f   : > { %v285_v23 = vadd.f32 %v284_v6, %v283_v13  ;;  %v362_v53 = vadd.f32 %v361_v45, %v360_v48  ;;  %v397_v48 = vld [vmem:[%s1685_s6 + $0x68] sm:$0xff] }
  0x41   : > { %v287_v29 = vadd.f32 %v286_v16, %v285_v23  ;;  %v364_v58 = vadd.f32 %v363_v51, %v362_v53  ;;  %v396_v51 = vld [vmem:[%s1685_s6 + $0x60] sm:$0xff]  ;;  %v395_v53 = vld [vmem:[%s1685_s6 + $0x58] sm:$0xff] }
  0x43   : > { %v289_v35 = vadd.f32 %v288_v25, %v287_v29  ;;  %v366_v63 = vadd.f32 %v365_v57, %v364_v58  ;;  %v394_v57 = vld [vmem:[%s1685_s6 + $0x50] sm:$0xff] }
  0x45   : > { %v290_v41 = vrot.slane %v289_v35, 4  ;;  %v368_v6 = vadd.f32 %v367_v59, %v366_v63  ;;  %v393_v59 = vld [vmem:[%s1685_s6 + $0x48] sm:$0xff]  ;;  %v392_v63 = vld [vmem:[%s1685_s6 + $0x40] sm:$0xff] }
  0x47   : > { %v291_v46 = vadd.f32 %v290_v41, %v289_v35  ;;  %v370_v10 = vadd.f32 %v369_v5, %v368_v6  ;;  %v380_v35 = vld [vmem:[%s2122_s2] sm:$0x1]  ;;  %v399_v41 = vld [vmem:[%s1685_s6 + $0x78] sm:$0xff] }
  0x48   : > { %v391_v6 = vld [vmem:[%s1685_s6 + $0x38] sm:$0xff] }
  0x49   : > { %v292_v52 = vrot.slane %v291_v46, 2  ;;  %v371_v13 = vrot.slane %v370_v10, 4 }
  0x4b   : > { %v293_v60 = vadd.f32 %v292_v52, %v291_v46  ;;  %v372_v16 = vadd.f32 %v371_v13, %v370_v10  ;;  %v390_v10 = vld [vmem:[%s1685_s6 + $0x30] sm:$0xff] }
  0x4d   : > { %v294_v8 = vrot.slane %v293_v60, 1  ;;  %v373_v19 = vrot.slane %v372_v16, 2 }
  0x4f   : > { %v295_v15 = vadd.f32 %v294_v8, %v293_v60  ;;  %v374_v23 = vadd.f32 %v373_v19, %v372_v16  ;;  %v388_v19 = vld [vmem:[%s1685_s6 + $0x20] sm:$0xff] }
  0x51   : > { %v296_v21 = vmul.f32 0.0051020407, %v295_v15  ;;  %v375_v24 = vrot.slane %v374_v23, 1  ;;  %v389_v15 = vld [vmem:[%s1685_s6 + $0x28] sm:$0xff] }
  0x53   : > { %v376_v25 = vadd.f32 %v375_v24, %v374_v23  ;;  %v378_v27 = vmul.f32 %v296_v21, %v296_v21  ;;  %v387_v23 = vld [vmem:[%s1685_s6 + $0x18] sm:$0xff] }
  0x55   : > { %v377_v28 = vmul.f32 0.0051020407, %v376_v25  ;;  %v386_v25 = vld [vmem:[%s1685_s6 + $0x10] sm:$0xff] }
  0x57   : > { %v379_v29 = vsub.f32 %v377_v28, %v378_v27  ;;  %v385_v28 = vld [vmem:[%s1685_s6 + $0x8] sm:$0xff] }
  0x59   : > { %v381_v31 = vadd.f32 1e-05, %v379_v29 }
  0x5b   : > { %1277 = vrsqrt.f32 %v381_v31  ;;  %v384_v31 = vld [vmem:[%s1685_s6] sm:$0xff]  ;;  %s1287_s6 = scalar_lea.vmem %s1286_s5, 6400 }
  0x5c   : > { %p1289_p2 = scmp.lt.s32.totalorder %s1287_s6, %s1281_s29 }
  0x5e   : > { %p1290_p3 = por %p1289_p2, %p1288_p1 }
  0x60   : > { %p1291_p4 = pnand %p1290_p3, %p1284_p0 }
  0x68   : > { %v1278_v38 = vpop.eup %1277 }
  0x69   : > { %v383_v39 = vmul.f32 %v1278_v38, %v380_v35 }
  0x6b   : > { %v1691_v42 = vrot.slane %v383_v39, %v1687_v36 }
  0x6d   : > { %v421_v45 = vmul.f32 %v1691_v42, %v399_v41  ;;  %v420_v46 = vmul.f32 %v1691_v42, %v398_v44  ;;  %v419_v50 = vmul.f32 %v1691_v42, %v397_v48  ;;  %v418_v52 = vmul.f32 %v1691_v42, %v396_v51 }
  0x6e   : > { %v417_v56 = vmul.f32 %v1691_v42, %v395_v53  ;;  %v416_v58 = vmul.f32 %v1691_v42, %v394_v57  ;;  %v415_v60 = vmul.f32 %v1691_v42, %v393_v59  ;;  %v414_v5 = vmul.f32 %v1691_v42, %v392_v63 }
  0x6f   : > { %1094 = vmatpush3.xpose.msk.msra.mxu0 %vm240_vm0, %v421_v45  ;;  %1216 = vmatpush3.xpose.msk.msra.mxu1 %vm240_vm0, %v421_v45  ;;  %v413_v8 = vmul.f32 %v1691_v42, %v391_v6  ;;  %v412_v13 = vmul.f32 %v1691_v42, %v390_v10  ;;  %v411_v16 = vmul.f32 %v1691_v42, %v389_v15 }
  0x70   : > { %1095 = vmatprep.subr.mxu0 %v1343_v3  ;;  %1201 = vmatprep.subr.mxu1 %v1343_v3  ;;  %v410_v21 = vmul.f32 %v1691_v42, %v388_v19  ;;  %v409_v24 = vmul.f32 %v1691_v42, %v387_v23  ;;  %v408_v27 = vmul.f32 %v1691_v42, %v386_v25 }
  0x71   : > { %v407_v29 = vmul.f32 %v1691_v42, %v385_v28  ;;  %v406_v32 = vmul.f32 %v1691_v42, %v384_v31 }
  0x73   : > { %1096 = vmatpush3.xpose.msk.msra.mxu0 %vm240_vm0, %v420_v46  ;;  %1217 = vmatpush3.xpose.msk.msra.mxu1 %vm240_vm0, %v420_v46 }
  0x74   : > { %1097 = vmatprep.subr.mxu0 %v1343_v3  ;;  %1202 = vmatprep.subr.mxu1 %v1343_v3 }
  0x77   : > { %1098 = vmatpush3.xpose.msk.msra.mxu0 %vm240_vm0, %v419_v50  ;;  %1218 = vmatpush3.xpose.msk.msra.mxu1 %vm240_vm0, %v419_v50 }
  0x78   : > { %1099 = vmatprep.subr.mxu0 %v1343_v3  ;;  %1203 = vmatprep.subr.mxu1 %v1343_v3 }
  0x7b   : > { %1100 = vmatpush3.xpose.msk.msra.mxu0 %vm240_vm0, %v418_v52  ;;  %1219 = vmatpush3.xpose.msk.msra.mxu1 %vm240_vm0, %v418_v52 }
  0x7c   : > { %1101 = vmatprep.subr.mxu0 %v1343_v3  ;;  %1204 = vmatprep.subr.mxu1 %v1343_v3 }
  0x7f   : > { %1102 = vmatpush3.xpose.msk.msra.mxu0 %vm240_vm0, %v417_v56  ;;  %1220 = vmatpush3.xpose.msk.msra.mxu1 %vm240_vm0, %v417_v56 }
  0x80   : > { %1103 = vmatprep.subr.mxu0 %v1343_v3  ;;  %1205 = vmatprep.subr.mxu1 %v1343_v3 }
  0x83   : > { %1104 = vmatpush3.xpose.msk.msra.mxu0 %vm240_vm0, %v416_v58  ;;  %1221 = vmatpush3.xpose.msk.msra.mxu1 %vm240_vm0, %v416_v58 }
  0x84   : > { %1105 = vmatprep.subr.mxu0 %v1343_v3  ;;  %1206 = vmatprep.subr.mxu1 %v1343_v3 }
  0x87   : > { %1106 = vmatpush3.xpose.msk.msra.mxu0 %vm240_vm0, %v415_v60  ;;  %1222 = vmatpush3.xpose.msk.msra.mxu1 %vm240_vm0, %v415_v60 }
  0x88   : > { %1107 = vmatprep.subr.mxu0 %v1343_v3  ;;  %1207 = vmatprep.subr.mxu1 %v1343_v3 }
  0x8b   : > { %1108 = vmatpush3.xpose.msk.msra.mxu0 %vm240_vm0, %v414_v5  ;;  %1223 = vmatpush3.xpose.msk.msra.mxu1 %vm240_vm0, %v414_v5 }
  0x8c   : > { %1109 = vmatprep.subr.mxu0 %v1343_v3  ;;  %1208 = vmatprep.subr.mxu1 %v1343_v3 }
  0x8f   : > { %1110 = vmatpush3.xpose.msk.msra.mxu0 %vm240_vm0, %v413_v8  ;;  %1224 = vmatpush3.xpose.msk.msra.mxu1 %vm240_vm0, %v413_v8 }
  0x90   : > { %1111 = vmatprep.subr.mxu0 %v1343_v3  ;;  %1209 = vmatprep.subr.mxu1 %v1343_v3 }
  0x93   : > { %1112 = vmatpush3.xpose.msk.msra.mxu0 %vm240_vm0, %v412_v13  ;;  %1225 = vmatpush3.xpose.msk.msra.mxu1 %vm240_vm0, %v412_v13 }
  0x94   : > { %1113 = vmatprep.subr.mxu0 %v1343_v3  ;;  %1210 = vmatprep.subr.mxu1 %v1343_v3 }
  0x97   : > { %1114 = vmatpush3.xpose.msk.msra.mxu0 %vm240_vm0, %v411_v16  ;;  %1226 = vmatpush3.xpose.msk.msra.mxu1 %vm240_vm0, %v411_v16 }
  0x98   : > { %1115 = vmatprep.subr.mxu0 %v1343_v3  ;;  %1211 = vmatprep.subr.mxu1 %v1343_v3 }
  0x9b   : > { %1116 = vmatpush3.xpose.msk.msra.mxu0 %vm240_vm0, %v410_v21  ;;  %1227 = vmatpush3.xpose.msk.msra.mxu1 %vm240_vm0, %v410_v21 }
  0x9c   : > { %1117 = vmatprep.subr.mxu0 %v1343_v3  ;;  %1212 = vmatprep.subr.mxu1 %v1343_v3 }
  0x9f   : > { %1118 = vmatpush3.xpose.msk.msra.mxu0 %vm240_vm0, %v409_v24  ;;  %1228 = vmatpush3.xpose.msk.msra.mxu1 %vm240_vm0, %v409_v24 }
  0xa0   : > { %1119 = vmatprep.subr.mxu0 %v1343_v3  ;;  %1213 = vmatprep.subr.mxu1 %v1343_v3 }
  0xa3   : > { %1120 = vmatpush3.xpose.msk.msra.mxu0 %vm240_vm0, %v408_v27  ;;  %1229 = vmatpush3.xpose.msk.msra.mxu1 %vm240_vm0, %v408_v27 }
  0xa4   : > { %1121 = vmatprep.subr.mxu0 %v1343_v3  ;;  %1214 = vmatprep.subr.mxu1 %v1343_v3 }
  0xa7   : > { %1122 = vmatpush3.xpose.msk.msra.mxu0 %vm240_vm0, %v407_v29  ;;  %1230 = vmatpush3.xpose.msk.msra.mxu1 %vm240_vm0, %v407_v29 }
  0xa8   : > { %1123 = vmatprep.subr.mxu0 %v1343_v3  ;;  %1215 = vmatprep.subr.mxu1 %v1343_v3 }
  0xab   : > { %1124 = vmatpush3.xpose.msk.msra.mxu0 %vm240_vm0, %v406_v32  ;;  %1231 = vmatpush3.xpose.msk.msra.mxu1 %vm240_vm0, %v406_v32 }
  0xae   : > { %1126 = vmatmul.mubr.msk.f32.vlgmr.msra.gmra.mxu0 %vm240_vm0, %v1425_v0  ;;  %1165 = vmatmul.mubr.msk.f32.vlgmr.msra.gmra.mxu1 %vm240_vm0, %v1535_v49 }
  0xaf   : > { %1128 = vmatprep.mubr.msk.f32.mxu0 %vm1344_vm1, %v1343_v3  ;;  %1167 = vmatprep.mubr.msk.f32.mxu1 %vm1344_vm1, %v1343_v3 }
  0xb2   : > { %1129 = vmatmul.mubr.msk.f32.gmra.mxu0 %vm240_vm0, %v1430_v1  ;;  %1168 = vmatmul.mubr.msk.f32.gmra.mxu1 %vm240_vm0, %v1545_v55 }
  0xb3   : > { %1131 = vmatprep.mubr.msk.f32.mxu0 %vm1344_vm1, %v1343_v3  ;;  %1170 = vmatprep.mubr.msk.f32.mxu1 %vm1344_vm1, %v1343_v3 }
  0xb6   : > { %1132 = vmatmul.mubr.msk.f32.gmra.mxu0 %vm240_vm0, %v1435_v2  ;;  %1171 = vmatmul.mubr.msk.f32.gmra.mxu1 %vm240_vm0, %v1555_v61 }
  0xb7   : > { %1134 = vmatprep.mubr.msk.f32.mxu0 %vm1344_vm1, %v1343_v3  ;;  %1173 = vmatprep.mubr.msk.f32.mxu1 %vm1344_vm1, %v1343_v3 }
  0xba   : > { %1135 = vmatmul.mubr.msk.f32.gmra.mxu0 %vm240_vm0, %v1441_v4  ;;  %1174 = vmatmul.mubr.msk.f32.gmra.mxu1 %vm240_vm0, %v1565_v9 }
  0xbb   : > { %1137 = vmatprep.mubr.msk.f32.mxu0 %vm1344_vm1, %v1343_v3  ;;  %1176 = vmatprep.mubr.msk.f32.mxu1 %vm1344_vm1, %v1343_v3 }
  0xbe   : > { %1138 = vmatmul.mubr.msk.f32.gmra.mxu0 %vm240_vm0, %v1451_v7  ;;  %1177 = vmatmul.mubr.msk.f32.gmra.mxu1 %vm240_vm0, %v1575_v18 }
  0xbf   : > { %1140 = vmatprep.mubr.msk.f32.mxu0 %vm1344_vm1, %v1343_v3  ;;  %1179 = vmatprep.mubr.msk.f32.mxu1 %vm1344_vm1, %v1343_v3 }
  0xc2   : > { %1141 = vmatmul.mubr.msk.f32.gmra.mxu0 %vm240_vm0, %v1460_v11  ;;  %1180 = vmatmul.mubr.msk.f32.gmra.mxu1 %vm240_vm0, %v1585_v26 }
  0xc3   : > { %1143 = vmatprep.mubr.msk.f32.mxu0 %vm1344_vm1, %v1343_v3  ;;  %1182 = vmatprep.mubr.msk.f32.mxu1 %vm1344_vm1, %v1343_v3 }
  0xc6   : > { %1144 = vmatmul.mubr.msk.f32.gmra.mxu0 %vm240_vm0, %v1467_v14  ;;  %1183 = vmatmul.mubr.msk.f32.gmra.mxu1 %vm240_vm0, %v1595_v33 }
  0xc7   : > { %1146 = vmatprep.mubr.msk.f32.mxu0 %vm1344_vm1, %v1343_v3  ;;  %1185 = vmatprep.mubr.msk.f32.mxu1 %vm1344_vm1, %v1343_v3 }
  0xca   : > { %1147 = vmatmul.mubr.msk.f32.gmra.mxu0 %vm240_vm0, %v1474_v17  ;;  %1186 = vmatmul.mubr.msk.f32.gmra.mxu1 %vm240_vm0, %v1605_v40 }
  0xcb   : > { %1149 = vmatprep.mubr.msk.f32.mxu0 %vm1344_vm1, %v1343_v3  ;;  %1188 = vmatprep.mubr.msk.f32.mxu1 %vm1344_vm1, %v1343_v3 }
  0xce   : > { %1150 = vmatmul.mubr.msk.f32.gmra.mxu0 %vm240_vm0, %v1481_v20  ;;  %1189 = vmatmul.mubr.msk.f32.gmra.mxu1 %vm240_vm0, %v1619_v47 }
  0xcf   : > { %1152 = vmatprep.mubr.msk.f32.mxu0 %vm1344_vm1, %v1343_v3  ;;  %1191 = vmatprep.mubr.msk.f32.mxu1 %vm1344_vm1, %v1343_v3 }
  0xd2   : > { %1153 = vmatmul.mubr.msk.f32.gmra.mxu0 %vm240_vm0, %v1486_v22  ;;  %1192 = vmatmul.mubr.msk.f32.gmra.mxu1 %vm240_vm0, %v1629_v54 }
  0xd3   : > { %1155 = vmatprep.mubr.msk.f32.mxu0 %vm1344_vm1, %v1343_v3  ;;  %1194 = vmatprep.mubr.msk.f32.mxu1 %vm1344_vm1, %v1343_v3 }
  0xd6   : > { %1156 = vmatmul.mubr.msk.f32.gmra.mxu0 %vm240_vm0, %v1503_v30  ;;  %1195 = vmatmul.mubr.msk.f32.gmra.mxu1 %vm240_vm0, %v1639_v62 }
  0xd7   : > { %1158 = vmatprep.mubr.msk.f32.mxu0 %vm1344_vm1, %v1343_v3  ;;  %1197 = vmatprep.mubr.msk.f32.mxu1 %vm1344_vm1, %v1343_v3 }
  0xda   : > { %1159 = vmatmul.mubr.msk.f32.gmra.mxu0 %vm240_vm0, %v1515_v37  ;;  %1198 = vmatmul.mubr.msk.f32.gmra.mxu1 %vm240_vm0, %v1649_v12 }
  0xdb   : > { %1161 = vmatprep.mubr.msk.f32.mxu0 %vm1344_vm1, %v1343_v3 }
  0xde   : > { %1162 = vmatmul.mubr.msk.f32.gmra.mxu0 %vm240_vm0, %v1525_v43 }
 0x16e   : > { %v1882_v0 = vpop.f32.mrf.mxu0  ;;  %v1884_v1 = vpop.f32.mrf.mxu1 }
 0x16f   : > { %v766_v39 = vmul.f32 %v1882_v0, %v1882_v0 }
 0x170   : > { %v1127_v2 = vpop.f32.mrf.mxu0  ;;  %v1166_v4 = vpop.f32.mrf.mxu1 }
 0x172   : > { %v1886_v7 = vpop.f32.mrf.mxu0  ;;  %v1888_v11 = vpop.f32.mrf.mxu1 }
 0x173   : > { %v767_v34 = vmul.f32 %v1886_v7, %v1886_v7  ;;  %v735_v41 = vadd.f32 %v1886_v7, %v1882_v0 }
 0x174   : > { %v1130_v14 = vpop.f32.mrf.mxu0  ;;  %v1169_v17 = vpop.f32.mrf.mxu1 }
 0x175   : > { %v791_v46 = vadd.f32 %v767_v34, %v766_v39 }
 0x176   : > { %v1890_v20 = vpop.f32.mrf.mxu0  ;;  %v1892_v22 = vpop.f32.mrf.mxu1 }
 0x177   : > { %v768_v42 = vmul.f32 %v1890_v20, %v1890_v20  ;;  %v736_v48 = vadd.f32 %v735_v41, %v1890_v20 }
 0x178   : > { %v1133_v3 = vpop.f32.mrf.mxu0  ;;  %v1172_v30 = vpop.f32.mrf.mxu1 }
 0x179   : > { %v792_v53 = vadd.f32 %v791_v46, %v768_v42 }
 0x17a   : > { %v1894_v37 = vpop.f32.mrf.mxu0  ;;  %v1896_v43 = vpop.f32.mrf.mxu1 }
 0x17b   : > { %v769_v50 = vmul.f32 %v1894_v37, %v1894_v37  ;;  %v737_v56 = vadd.f32 %v736_v48, %v1894_v37 }
 0x17c   : > { %v1136_v49 = vpop.f32.mrf.mxu0  ;;  %v1175_v55 = vpop.f32.mrf.mxu1 }
 0x17d   : > { %v793_v60 = vadd.f32 %v792_v53, %v769_v50  ;;  %v779_v53 = vmul.f32 %v1884_v1, %v1884_v1 }
 0x17e   : > { %v1898_v61 = vpop.f32.mrf.mxu0  ;;  %v1900_v9 = vpop.f32.mrf.mxu1 }
 0x17f   : > { %v770_v57 = vmul.f32 %v1898_v61, %v1898_v61  ;;  %v738_v63 = vadd.f32 %v737_v56, %v1898_v61 }
 0x180   : > { %v1139_v18 = vpop.f32.mrf.mxu0  ;;  %v1178_v26 = vpop.f32.mrf.mxu1 }
 0x181   : > { %v794_v10 = vadd.f32 %v793_v60, %v770_v57  ;;  %v780_v60 = vmul.f32 %v1888_v11, %v1888_v11 }
 0x182   : > { %v1902_v33 = vpop.f32.mrf.mxu0  ;;  %v1904_v40 = vpop.f32.mrf.mxu1 }
 0x183   : > { %v771_v5 = vmul.f32 %v1902_v33, %v1902_v33  ;;  %v739_v13 = vadd.f32 %v738_v63, %v1902_v33 }
 0x184   : > { %v1142_v47 = vpop.f32.mrf.mxu0  ;;  %v1181_v54 = vpop.f32.mrf.mxu1 }
 0x185   : > { %v795_v21 = vadd.f32 %v794_v10, %v771_v5 }
 0x186   : > { %v1906_v62 = vpop.f32.mrf.mxu0  ;;  %v1908_v12 = vpop.f32.mrf.mxu1 }
 0x187   : > { %v772_v15 = vmul.f32 %v1906_v62, %v1906_v62  ;;  %v740_v23 = vadd.f32 %v739_v13, %v1906_v62  ;;  %v782_v13 = vmul.f32 %v1896_v43, %v1896_v43 }
 0x188   : > { %v1145_v35 = vpop.f32.mrf.mxu0  ;;  %v1184_v38 = vpop.f32.mrf.mxu1 }
 0x189   : > { %v796_v28 = vadd.f32 %v795_v21, %v772_v15 }
 0x18a   : > { %v1918_v44 = vpop.f32.mrf.mxu0  ;;  %v1920_v45 = vpop.f32.mrf.mxu1 }
 0x18b   : > { %v773_v24 = vmul.f32 %v1918_v44, %v1918_v44  ;;  %v741_v29 = vadd.f32 %v740_v23, %v1918_v44  ;;  %v783_v23 = vmul.f32 %v1900_v9, %v1900_v9 }
 0x18c   : > { %v1148_v51 = vpop.f32.mrf.mxu0  ;;  %v1187_v52 = vpop.f32.mrf.mxu1 }
 0x18d   : > { %v797_v4 = vadd.f32 %v796_v28, %v773_v24 }
 0x18e   : > { %v1928_v58 = vpop.f32.mrf.mxu0  ;;  %v1930_v59 = vpop.f32.mrf.mxu1 }
 0x18f   : > { %v774_v31 = vmul.f32 %v1928_v58, %v1928_v58  ;;  %v742_v14 = vadd.f32 %v741_v29, %v1928_v58 }
 0x190   : > { %v1151_v6 = vpop.f32.mrf.mxu0  ;;  %v1190_v8 = vpop.f32.mrf.mxu1 }
 0x191   : > { %v798_v49 = vadd.f32 %v797_v4, %v774_v31  ;;  %v781_v6 = vmul.f32 %v1892_v22, %v1892_v22  ;;  %v785_v4 = vmul.f32 %v1908_v12, %v1908_v12 }
 0x192   : > { %v1938_v16 = vpop.f32.mrf.mxu0  ;;  %v1940_v19 = vpop.f32.mrf.mxu1 }
 0x193   : > { %v775_v17 = vmul.f32 %v1938_v16, %v1938_v16  ;;  %v743_v55 = vadd.f32 %v742_v14, %v1938_v16 }
 0x194   : > { %v1154_v25 = vpop.f32.mrf.mxu0  ;;  %v1193_v27 = vpop.f32.mrf.mxu1 }
 0x195   : > { %v799_v54 = vadd.f32 %v798_v49, %v775_v17  ;;  %v784_v27 = vmul.f32 %v1904_v40, %v1904_v40 }
 0x196   : > { %v1948_v32 = vpop.f32.mrf.mxu0  ;;  %v1950_v2 = vpop.f32.mrf.mxu1 }
 0x197   : > { %v776_v18 = vmul.f32 %v1948_v32, %v1948_v32  ;;  %v744_v34 = vadd.f32 %v743_v55, %v1948_v32 }
 0x198   : > { %v1157_v3 = vpop.f32.mrf.mxu0  ;;  %v1196_v30 = vpop.f32.mrf.mxu1 }
 0x199   : > { %v800_v41 = vadd.f32 %v799_v54, %v776_v18  ;;  %v786_v30 = vmul.f32 %v1920_v45, %v1920_v45  ;;  %v787_v18 = vmul.f32 %v1930_v59, %v1930_v59 }
 0x19a   : > { %v1958_v26 = vpop.f32.mrf.mxu0  ;;  %v1960_v47 = vpop.f32.mrf.mxu1 }
 0x19b   : > { %v777_v35 = vmul.f32 %v1958_v26, %v1958_v26  ;;  %v745_v42 = vadd.f32 %v744_v34, %v1958_v26 }
 0x19c   : > { %v1160_v38 = vpop.f32.mrf.mxu0  ;;  %v1199_v39 = vpop.f32.mrf.mxu1 }
 0x19d   : > { %v801_v48 = vadd.f32 %v800_v41, %v777_v35  ;;  %v788_v35 = vmul.f32 %v1940_v19, %v1940_v19  ;;  %v789_v41 = vmul.f32 %v1950_v2, %v1950_v2 }
 0x19e   : > { %v1966_v46 = vpop.f32.mrf.mxu0 }
 0x19f   : > { %v746_v50 = vadd.f32 %v745_v42, %v1966_v46  ;;  %v778_v51 = vmul.f32 %v1966_v46, %v1966_v46  ;;  %v790_v42 = vmul.f32 %v1960_v47, %v1960_v47 }
 0x1a0   : > { %v1163_v52 = vpop.f32.mrf.mxu0 }
 0x1a1   : > { %v747_v56 = vadd.f32 %v746_v50, %v1884_v1  ;;  %v802_v57 = vadd.f32 %v801_v48, %v778_v51 }
 0x1a3   : > { %v748_v63 = vadd.f32 %v747_v56, %v1888_v11  ;;  %v803_v5 = vadd.f32 %v802_v57, %v779_v53 }
 0x1a5   : > { %v749_v8 = vadd.f32 %v748_v63, %v1892_v22  ;;  %v804_v10 = vadd.f32 %v803_v5, %v780_v60 }
 0x1a7   : > { %v805_v15 = vadd.f32 %v804_v10, %v781_v6  ;;  %v750_v21 = vadd.f32 %v749_v8, %v1896_v43 }
 0x1a9   : > { %v751_v24 = vadd.f32 %v750_v21, %v1900_v9  ;;  %v806_v25 = vadd.f32 %v805_v15, %v782_v13 }
 0x1ab   : > { %v752_v28 = vadd.f32 %v751_v24, %v1904_v40  ;;  %v807_v29 = vadd.f32 %v806_v25, %v783_v23 }
 0x1ad   : > { %v753_v31 = vadd.f32 %v752_v28, %v1908_v12  ;;  %v808_v14 = vadd.f32 %v807_v29, %v784_v27  ;;  %v826_v28 = vld [vmem:[%s214_s11] sm:$0x1] }
 0x1af   : > { %v809_v17 = vadd.f32 %v808_v14, %v785_v4  ;;  %v754_v3 = vadd.f32 %v753_v31, %v1920_v45  ;;  %v828_v4 = vld [vmem:[%s214_s11 + $0x1] sm:$0x1] }
 0x1b1   : > { %v810_v49 = vadd.f32 %v809_v17, %v786_v30  ;;  %v755_v55 = vadd.f32 %v754_v3, %v1930_v59 }
 0x1b3   : > { %v811_v54 = vadd.f32 %v810_v49, %v787_v18  ;;  %v756_v34 = vadd.f32 %v755_v55, %v1940_v19 }
 0x1b5   : > { %v812_v38 = vadd.f32 %v811_v54, %v788_v35  ;;  %v757_v39 = vadd.f32 %v756_v34, %v1950_v2 }
 0x1b7   : > { %v813_v48 = vadd.f32 %v812_v38, %v789_v41  ;;  %v758_v50 = vadd.f32 %v757_v39, %v1960_v47 }
 0x1b9   : > { %v759_v51 = vrot.slane %v758_v50, 4  ;;  %v814_v52 = vadd.f32 %v813_v48, %v790_v42 }
 0x1bb   : > { %v760_v53 = vadd.f32 %v759_v51, %v758_v50  ;;  %v815_v56 = vrot.slane %v814_v52, 4 }
 0x1bd   : > { %v761_v57 = vrot.slane %v760_v53, 2  ;;  %v816_v60 = vadd.f32 %v815_v56, %v814_v52 }
 0x1bf   : > { %v762_v63 = vadd.f32 %v761_v57, %v760_v53  ;;  %v817_v5 = vrot.slane %v816_v60, 2 }
 0x1c1   : > { %v763_v6 = vrot.slane %v762_v63, 1  ;;  %v818_v8 = vadd.f32 %v817_v5, %v816_v60 }
 0x1c3   : > { %v764_v10 = vadd.f32 %v763_v6, %v762_v63  ;;  %v819_v13 = vrot.slane %v818_v8, 1 }
 0x1c5   : > { %v765_v15 = vmul.f32 0.0051020407, %v764_v10  ;;  %v820_v21 = vadd.f32 %v819_v13, %v818_v8 }
 0x1c7   : > { %v821_v23 = vmul.f32 0.0051020407, %v820_v21  ;;  %v822_v24 = vmul.f32 %v765_v15, %v765_v15 }
 0x1c9   : > { %v823_v25 = vsub.f32 %v821_v23, %v822_v24 }
 0x1cb   : > { %v824_v27 = vadd.f32 1e-05, %v823_v25 }
 0x1cd   : > { %1279 = vrsqrt.f32 %v824_v27 }
 0x1da   : > { %v1280_v29 = vpop.eup %1279 }
 0x1db   : > { %v827_v31 = vmul.f32 %v1280_v29, %v826_v28 }
 0x1dd   : > { %v829_v14 = vmul.f32 %v827_v31, %v765_v15  ;;  %v834_v17 = vrot.slane %v827_v31, %v1687_v36 }
 0x1df   : > { %v830_v3 = vsub.f32 %v828_v4, %v829_v14  ;;  %v859_v30 = vmul.f32 %v834_v17, %v1960_v47  ;;  %v835_v49 = vmul.f32 %v834_v17, %v1882_v0  ;;  %v836_v55 = vmul.f32 %v834_v17, %v1886_v7 }
 0x1e0   : > { %v837_v18 = vmul.f32 %v834_v17, %v1890_v20  ;;  %v838_v54 = vmul.f32 %v834_v17, %v1894_v37  ;;  %v839_v34 = vmul.f32 %v834_v17, %v1898_v61  ;;  %v840_v35 = vmul.f32 %v834_v17, %v1902_v33 }
 0x1e1   : > { %v863_v38 = vrot.slane %v830_v3, %v1687_v36  ;;  %v841_v39 = vmul.f32 %v834_v17, %v1906_v62  ;;  %v842_v41 = vmul.f32 %v834_v17, %v1918_v44  ;;  %v843_v47 = vmul.f32 %v834_v17, %v1928_v58 }
 0x1e2   : > { %v844_v0 = vmul.f32 %v834_v17, %v1938_v16  ;;  %v845_v7 = vmul.f32 %v834_v17, %v1948_v32  ;;  %v846_v20 = vmul.f32 %v834_v17, %v1958_v26  ;;  %v847_v37 = vmul.f32 %v834_v17, %v1966_v46 }
 0x1e3   : > { %v888_v42 = vadd.f32 %v863_v38, %v859_v30  ;;  %v848_v61 = vmul.f32 %v834_v17, %v1884_v1  ;;  %v849_v33 = vmul.f32 %v834_v17, %v1888_v11  ;;  %v850_v36 = vmul.f32 %v834_v17, %v1892_v22 }
 0x1e4   : > { %v851_v62 = vmul.f32 %v834_v17, %v1896_v43  ;;  %v852_v44 = vmul.f32 %v834_v17, %v1900_v9  ;;  %v853_v58 = vmul.f32 %v834_v17, %v1904_v40  ;;  %v854_v16 = vmul.f32 %v834_v17, %v1908_v12 }
 0x1e5   : > { %913 = vst [vmem:[%s2038_s14 + $0xc0] sm:$0xff] %v888_v42  ;;  %v855_v1 = vmul.f32 %v834_v17, %v1920_v45  ;;  %v856_v11 = vmul.f32 %v834_v17, %v1930_v59  ;;  %v857_v32 = vmul.f32 %v834_v17, %v1940_v19  ;;  %v858_v22 = vmul.f32 %v834_v17, %v1950_v2 }
 0x1e6   : > { %v864_v43 = vadd.f32 %v863_v38, %v835_v49  ;;  %v865_v9 = vadd.f32 %v863_v38, %v836_v55  ;;  %v866_v40 = vadd.f32 %v863_v38, %v837_v18  ;;  %v867_v12 = vadd.f32 %v863_v38, %v838_v54 }
 0x1e7   : > { %v868_v26 = vadd.f32 %v863_v38, %v839_v34  ;;  %v869_v46 = vadd.f32 %v863_v38, %v840_v35  ;;  %v870_v48 = vadd.f32 %v863_v38, %v841_v39  ;;  %v871_v45 = vadd.f32 %v863_v38, %v842_v41 }
 0x1e8   : > { %v872_v59 = vadd.f32 %v863_v38, %v843_v47  ;;  %v873_v19 = vadd.f32 %v863_v38, %v844_v0  ;;  %v874_v2 = vadd.f32 %v863_v38, %v845_v7  ;;  %v875_v50 = vadd.f32 %v863_v38, %v846_v20  ;;  %889 = vst [vmem:[%s2038_s14] sm:$0xff] %v864_v43 }
 0x1e9   : > { %890 = vst [vmem:[%s2038_s14 + $0x8] sm:$0xff] %v865_v9  ;;  %891 = vst [vmem:[%s2038_s14 + $0x10] sm:$0xff] %v866_v40  ;;  %v876_v51 = vadd.f32 %v863_v38, %v847_v37  ;;  %v877_v52 = vadd.f32 %v863_v38, %v848_v61  ;;  %v878_v53 = vadd.f32 %v863_v38, %v849_v33 }
 0x1ea   : > { %892 = vst [vmem:[%s2038_s14 + $0x18] sm:$0xff] %v867_v12  ;;  %v879_v56 = vadd.f32 %v863_v38, %v850_v36  ;;  %893 = vst [vmem:[%s2038_s14 + $0x20] sm:$0xff] %v868_v26  ;;  %v880_v57 = vadd.f32 %v863_v38, %v851_v62  ;;  %v881_v60 = vadd.f32 %v863_v38, %v852_v44 }
 0x1eb   : > { %894 = vst [vmem:[%s2038_s14 + $0x28] sm:$0xff] %v869_v46  ;;  %895 = vst [vmem:[%s2038_s14 + $0x30] sm:$0xff] %v870_v48  ;;  %v882_v63 = vadd.f32 %v863_v38, %v853_v58  ;;  %v883_v5 = vadd.f32 %v863_v38, %v854_v16  ;;  %v884_v6 = vadd.f32 %v863_v38, %v855_v1 }
 0x1ec   : > { %896 = vst [vmem:[%s2038_s14 + $0x38] sm:$0xff] %v871_v45  ;;  %897 = vst [vmem:[%s2038_s14 + $0x40] sm:$0xff] %v872_v59  ;;  %v885_v8 = vadd.f32 %v863_v38, %v856_v11  ;;  %v886_v10 = vadd.f32 %v863_v38, %v857_v32  ;;  %v887_v13 = vadd.f32 %v863_v38, %v858_v22 }
 0x1ed   : > { %898 = vst [vmem:[%s2038_s14 + $0x48] sm:$0xff] %v873_v19  ;;  %899 = vst [vmem:[%s2038_s14 + $0x50] sm:$0xff] %v874_v2 }
 0x1ee   : > { %900 = vst [vmem:[%s2038_s14 + $0x58] sm:$0xff] %v875_v50  ;;  %901 = vst [vmem:[%s2038_s14 + $0x60] sm:$0xff] %v876_v51 }
 0x1ef   : > { %902 = vst [vmem:[%s2038_s14 + $0x68] sm:$0xff] %v877_v52  ;;  %903 = vst [vmem:[%s2038_s14 + $0x70] sm:$0xff] %v878_v53 }
 0x1f0   : > { %904 = vst [vmem:[%s2038_s14 + $0x78] sm:$0xff] %v879_v56  ;;  %905 = vst [vmem:[%s2038_s14 + $0x80] sm:$0xff] %v880_v57 }
 0x1f1   : > { %906 = vst [vmem:[%s2038_s14 + $0x88] sm:$0xff] %v881_v60  ;;  %907 = vst [vmem:[%s2038_s14 + $0x90] sm:$0xff] %v882_v63 }
 0x1f2   : > { %908 = vst [vmem:[%s2038_s14 + $0x98] sm:$0xff] %v883_v5  ;;  %909 = vst [vmem:[%s2038_s14 + $0xa0] sm:$0xff] %v884_v6 }
 0x1f3   : > { %910 = vst [vmem:[%s2038_s14 + $0xa8] sm:$0xff] %v885_v8  ;;  %911 = vst [vmem:[%s2038_s14 + $0xb0] sm:$0xff] %v886_v10 }
 0x1f4   : > { %912 = vst [vmem:[%s2038_s14 + $0xb8] sm:$0xff] %v887_v13 }
 0x1f5   : > { %1294 = shalt.err (!%p1291_p4)
}
 0x1f6   : > { %s1295_s7 = scalar_lea.hbm %s2058_s27, 3200  ;;  %s1299_s10 = scalar_lea.hbm %s2124_s4, 9600 }
 0x1f7   : > { %p1296_p7 = scmp.ne.s32.totalorder %s2058_s27, %s1295_s7  ;;  %p1300_p10 = scmp.lt.s32.totalorder %s2058_s27, %s2124_s4 }
 0x1f8   : > { %p1301_p11 = scmp.lt.s32.totalorder %s1299_s10, %s1295_s7 }
 0x1f9   : > { %p1297_p8 = pnand %p1296_p7, %p1412_p5 }
 0x1fa   : > { %p1302_p12 = por %p1301_p11, %p1300_p10 }
 0x1fb   : > { %p1298_p9 = pneg %p1297_p8 }
 0x1fd   : > { %p1303_p13 = pnand %p1302_p12, %p1298_p9 }
 0x1ff   : > { %1306 = shalt.err (!%p1303_p13)
}
 0x200   : > { %s1346_s13 = smov 128   ;;  %s1347_s14 = smov 384  }
 0x201   : > { %s1348_s20 = smov 8  }
 0x202   : > { %1233 = dma.vmem_to_hbm [thread:$0]  (%p1412_p5), %s2064_s22, 3200, %s2058_s27, %s2080_s28, %s1346_s13, %s1347_s14, %s1348_s20  }
 0x203 PF: > { %p1239_p0 = scmp.ge.s32.totalorder %s1341_s18, 2  ;;  %s942_s19 = sand.u32 1, %s1329_s15  }
 0x204   : > { %s943_s23 = scalar_lea.sflag [#allocation3], %s942_s19 }
 0x205   : > { %p1236_p1 = pnand %p1239_p0, %p1416_p6 }
 0x207   : > { %p1237_p2 = pneg %p1236_p1 }
 0x209   : > { %1324 = dma.done.wait (%p1237_p2), %s943_s23, 3200  }
 0x20a   : > { %1326 = vsyncadd (%p1237_p2), %s943_s23, 4294964096  ;;  %p14_p3 = scmp.ge.s32.totalorder %s1399_s21, 5   ;;  %s2127_s15 = smov %s1333_s16 }
 0x20b   : > { %s2128_s16 = smov %s1337_s17  ;;  %s2129_s17 = smov %s1410_s24 }
 0x20c   : > { %s2130_s18 = smov %s1399_s21  ;;  %16 = sbr.rel (!%p14_p3) target bundleno = 3 (0x3), region = 74 }
 0x211   :  { %948 = vsyncpa [#allocation3], 1 }
 0x212   :  { %950 = vsyncpa [#allocation3 + $0x1], 1 }

</bundles_post_ra>
